<compile_context>
chip_gen: v5e
topology: v5e:2x2
jax: 0.10.0
libtpu: 0.0.40
codegen_flags: <defaults>
</compile_context>

<pallas_src>
import jax
import jax.numpy as jnp
from jax.experimental import pallas as pl
from jax.experimental.pallas import tpu as pltpu

config = {"neuron_nums": 32}

_LANES = 128  # vreg lane width


def net_kernel(xT_ref, w1_ref, b1_ref, w2_ref, b2_ref, outT_ref):
    # xT: (F, TB), w1: (N, F), b1: (N, 1), w2: (A, N), b2: (A, 1), outT: (A, TB)
    xT = xT_ref[...]
    # fc1 + ReLU
    h = jnp.dot(w1_ref[...], xT, preferred_element_type=jnp.float32) + b1_ref[...]
    h = jnp.maximum(h, 0.0)
    # fc2
    y = jnp.dot(w2_ref[...], h, preferred_element_type=jnp.float32) + b2_ref[...]
    # softmax over the action axis (axis 0 in the transposed layout)
    y = y - jnp.max(y, axis=0, keepdims=True)
    e = jnp.exp(y)
    denom = jnp.sum(e, axis=0, keepdims=True)
    # Exact division: the approximate EUP reciprocal was not accurate enough
    # for the 1e-4 row-sum tolerance (and is the reason the previous run failed).
    outT_ref[...] = e / denom


def net_forward(x, w1, b1, w2, b2, *, tb=512):
    """x: (batch, F). w1: (N, F), b1: (N, 1), w2: (A, N), b2: (A, 1). Returns (batch, A)."""
    batch, feat = x.shape
    neurons = w1.shape[0]
    actions = w2.shape[0]

    # Batch tile: multiple of 128 lanes, capped at `tb` (kept small enough that
    # double-buffered x/out tiles + resident weights fit v7x's 32 MiB scoped VMEM).
    padded = pl.cdiv(batch, _LANES) * _LANES
    block_b = min(tb, padded)
    padded = pl.cdiv(padded, block_b) * block_b

    # Transpose so batch is the lane (last) axis; zero-pad the batch tail.
    xT = x.T
    if padded != batch:
        xT = jnp.pad(xT, ((0, 0), (0, padded - batch)))

    grid = (padded // block_b,)

    outT = pl.pallas_call(
        net_kernel,
        out_shape=jax.ShapeDtypeStruct((actions, padded), jnp.float32),
        grid=grid,
        in_specs=[
            pl.BlockSpec((feat, block_b), lambda i: (0, i)),     # x^T tile (pipelined)
            pl.BlockSpec((neurons, feat), lambda i: (0, 0)),     # W1 (resident)
            pl.BlockSpec((neurons, 1), lambda i: (0, 0)),        # b1 (resident)
            pl.BlockSpec((actions, neurons), lambda i: (0, 0)),  # W2 (resident)
            pl.BlockSpec((actions, 1), lambda i: (0, 0)),        # b2 (resident)
        ],
        out_specs=pl.BlockSpec((actions, block_b), lambda i: (0, i)),
        compiler_params=pltpu.CompilerParams(
            dimension_semantics=("parallel",),
        ),
    )(xT, w1, b1, w2, b2)

    # Back to (batch, actions); drop batch padding.
    return outT[:, :batch].T


def init_params(key, feature_numbers, action_numbers, neuron_nums):
    """PyTorch nn.Linear layout: weight (out, in), bias broadcastable as (out, 1)."""
    k1, k2, k3, k4 = jax.random.split(key, 4)
    # Matches `weight.data.normal_(0, 0.1)` in the PyTorch module.
    w1 = (0.1 * jax.random.normal(k1, (neuron_nums, feature_numbers))).astype(jnp.float32)
    w2 = (0.1 * jax.random.normal(k2, (action_numbers, neuron_nums))).astype(jnp.float32)
    # PyTorch default bias init: U(-1/sqrt(fan_in), 1/sqrt(fan_in)).
    bound1 = 1.0 / jnp.sqrt(jnp.float32(feature_numbers))
    bound2 = 1.0 / jnp.sqrt(jnp.float32(neuron_nums))
    b1 = jax.random.uniform(k3, (neuron_nums, 1), minval=-bound1, maxval=bound1).astype(jnp.float32)
    b2 = jax.random.uniform(k4, (action_numbers, 1), minval=-bound2, maxval=bound2).astype(jnp.float32)
    return w1, b1, w2, b2


if __name__ == "__main__":
    key = jax.random.PRNGKey(0)
    feature_numbers = 16
    action_numbers = 4
    neuron_nums = config["neuron_nums"]
    batch = 8  # NOTE: at this toy size plain XLA fusion beats any hand kernel;
               # the Pallas path pays off only once batch is large (it tiles/pipelines then).

    kx, kp = jax.random.split(key)
    x = jax.random.normal(kx, (batch, feature_numbers), dtype=jnp.float32)
    w1, b1, w2, b2 = init_params(kp, feature_numbers, action_numbers, neuron_nums)

    out = net_forward(x, w1, b1, w2, b2)
    out = jax.block_until_ready(out)

    # Sanity: shape + softmax rows sum to 1.
    assert out.shape == (batch, action_numbers)
    assert jnp.allclose(jnp.sum(out, axis=1), 1.0, atol=1e-4)

    # Cross-check against pure-JAX reference (PyTorch semantics).
    ref_h = jnp.maximum(x @ w1.T + b1.T, 0.0)
    ref_y = ref_h @ w2.T + b2.T
    ref = jax.nn.softmax(ref_y, axis=1)
    assert jnp.allclose(out, ref, atol=1e-4)

    print("KERNEL_OK")
</pallas_src>

<mosaic_0001>
module attributes {stable_mosaic.version = 11 : i64} {
  func.func @net_kernel(%arg0: i32, %arg1: memref<16x128xf32, #tpu.memory_space<vmem>>, %arg2: memref<32x16xf32, #tpu.memory_space<vmem>>, %arg3: memref<32x1xf32, #tpu.memory_space<vmem>>, %arg4: memref<4x32xf32, #tpu.memory_space<vmem>>, %arg5: memref<4x1xf32, #tpu.memory_space<vmem>>, %arg6: memref<4x128xf32, #tpu.memory_space<vmem>>) attributes {dimension_semantics = [#tpu.dimension_semantics<parallel>], iteration_bounds = array<i64: 1>, scalar_prefetch = 0 : i64, scratch_operands = 0 : i64, tpu.core_type = #tpu.core_type<tc>, window_params = [{transform_indices = @transform_0, window_bounds = array<i64: 16, 128>}, {pipeline_mode = #tpu.pipeline_mode<synchronous>, transform_indices = @transform_1, window_bounds = array<i64: 32, 16>}, {pipeline_mode = #tpu.pipeline_mode<synchronous>, transform_indices = @transform_2, window_bounds = array<i64: 32, 1>}, {pipeline_mode = #tpu.pipeline_mode<synchronous>, transform_indices = @transform_3, window_bounds = array<i64: 4, 32>}, {pipeline_mode = #tpu.pipeline_mode<synchronous>, transform_indices = @transform_4, window_bounds = array<i64: 4, 1>}, {transform_indices = @transform_5, window_bounds = array<i64: 4, 128>}]} {
    %c0 = arith.constant 0 : index
    %c0_0 = arith.constant 0 : index
    %0 = vector.load %arg1[%c0, %c0_0] : memref<16x128xf32, #tpu.memory_space<vmem>>, vector<16x128xf32>
    %c0_1 = arith.constant 0 : index
    %c0_2 = arith.constant 0 : index
    %1 = vector.load %arg2[%c0_1, %c0_2] : memref<32x16xf32, #tpu.memory_space<vmem>>, vector<32x16xf32>
    %cst = arith.constant dense<0.000000e+00> : vector<32x128xf32>
    %2 = tpu.matmul %1, %0, %cst {dimension_numbers = #tpu.dot_dimension_numbers<[1], [0], [0], [1], [0, 0, 1, 1], [], []>} : vector<32x16xf32>, vector<16x128xf32>, vector<32x128xf32> -> vector<32x128xf32>
    %c0_3 = arith.constant 0 : index
    %c0_4 = arith.constant 0 : index
    %3 = vector.load %arg3[%c0_3, %c0_4] : memref<32x1xf32, #tpu.memory_space<vmem>>, vector<32x1xf32>
    %4 = vector.broadcast %3 : vector<32x1xf32> to vector<32x128xf32>
    %5 = arith.addf %2, %4 : vector<32x128xf32>
    %cst_5 = arith.constant 0.000000e+00 : f32
    %6 = vector.broadcast %cst_5 : f32 to vector<32x128xf32>
    %7 = arith.maximumf %5, %6 : vector<32x128xf32>
    %c0_6 = arith.constant 0 : index
    %c0_7 = arith.constant 0 : index
    %8 = vector.load %arg4[%c0_6, %c0_7] : memref<4x32xf32, #tpu.memory_space<vmem>>, vector<4x32xf32>
    %cst_8 = arith.constant dense<0.000000e+00> : vector<4x128xf32>
    %9 = tpu.matmul %8, %7, %cst_8 {dimension_numbers = #tpu.dot_dimension_numbers<[1], [0], [0], [1], [0, 0, 1, 1], [], []>} : vector<4x32xf32>, vector<32x128xf32>, vector<4x128xf32> -> vector<4x128xf32>
    %c0_9 = arith.constant 0 : index
    %c0_10 = arith.constant 0 : index
    %10 = vector.load %arg5[%c0_9, %c0_10] : memref<4x1xf32, #tpu.memory_space<vmem>>, vector<4x1xf32>
    %11 = vector.broadcast %10 : vector<4x1xf32> to vector<4x128xf32>
    %12 = arith.addf %9, %11 : vector<4x128xf32>
    %cst_11 = arith.constant dense<0xFF800000> : vector<128xf32>
    %13 = vector.multi_reduction <maximumf>, %12, %cst_11 [0] : vector<4x128xf32> to vector<128xf32>
    %14 = vector.shape_cast %13 : vector<128xf32> to vector<1x128xf32>
    %15 = vector.broadcast %14 : vector<1x128xf32> to vector<4x128xf32>
    %16 = arith.subf %12, %15 : vector<4x128xf32>
    %17 = math.exp %16 : vector<4x128xf32>
    %cst_12 = arith.constant dense<0.000000e+00> : vector<128xf32>
    %18 = vector.multi_reduction <add>, %17, %cst_12 [0] : vector<4x128xf32> to vector<128xf32>
    %19 = vector.shape_cast %18 : vector<128xf32> to vector<1x128xf32>
    %20 = vector.broadcast %19 : vector<1x128xf32> to vector<4x128xf32>
    %21 = arith.divf %17, %20 : vector<4x128xf32>
    %c0_13 = arith.constant 0 : index
    %c0_14 = arith.constant 0 : index
    %22 = vector.load %arg6[%c0_13, %c0_14] : memref<4x128xf32, #tpu.memory_space<vmem>>, vector<4x128xf32>
    tpu.vector_store %arg6[%c0_13, %c0_14], %21 {strides = array<i32>} : memref<4x128xf32, #tpu.memory_space<vmem>>, vector<4x128xf32>,
    return
  }
  func.func @transform_0(%arg0: i32) -> (i32, i32) {
    %c0_i32 = arith.constant 0 : i32
    %c0_i32_0 = arith.constant 0 : i32
    return %c0_i32, %arg0 : i32, i32
  }
  func.func @transform_1(%arg0: i32) -> (i32, i32) {
    %c0_i32 = arith.constant 0 : i32
    %c0_i32_0 = arith.constant 0 : i32
    %c0_i32_1 = arith.constant 0 : i32
    return %c0_i32, %c0_i32_0 : i32, i32
  }
  func.func @transform_2(%arg0: i32) -> (i32, i32) {
    %c0_i32 = arith.constant 0 : i32
    %c0_i32_0 = arith.constant 0 : i32
    %c0_i32_1 = arith.constant 0 : i32
    return %c0_i32, %c0_i32_0 : i32, i32
  }
  func.func @transform_3(%arg0: i32) -> (i32, i32) {
    %c0_i32 = arith.constant 0 : i32
    %c0_i32_0 = arith.constant 0 : i32
    %c0_i32_1 = arith.constant 0 : i32
    return %c0_i32, %c0_i32_0 : i32, i32
  }
  func.func @transform_4(%arg0: i32) -> (i32, i32) {
    %c0_i32 = arith.constant 0 : i32
    %c0_i32_0 = arith.constant 0 : i32
    %c0_i32_1 = arith.constant 0 : i32
    return %c0_i32, %c0_i32_0 : i32, i32
  }
  func.func @transform_5(%arg0: i32) -> (i32, i32) {
    %c0_i32 = arith.constant 0 : i32
    %c0_i32_0 = arith.constant 0 : i32
    return %c0_i32, %arg0 : i32, i32
  }
}

</mosaic_0001>

<bundles_post_ra>
// kernel: tpu_custom_call.1
= control target key start
LH: loop header
LB: loop body
LE: loop exit
PB: predicated region body
PF: predicated region fallthrough
CT: control target
= control target key end

     0   :  { %vm51_vm0 = vcmask 130048   ;;  %v222_v4 = vmov 0   ;;  %s297_s0 = inlined_call_operand.vmem [shape: f32[16,128], index: 0, kind: input, shape index: {}]   ;;  %s298_s1 = inlined_call_operand.vmem [shape: f32[32,16], index: 1, kind: input, shape index: {}]   ;;  %s299_s2 = inlined_call_operand.vmem [shape: f32[32,1], index: 2, kind: input, shape index: {}]   ;;  %s300_s3 = inlined_call_operand.vmem [shape: f32[4,32], index: 3, kind: input, shape index: {}]   ;;  %s301_s4 = inlined_call_operand.vmem [shape: f32[4,1], index: 4, kind: input, shape index: {}]   ;;  %s302_s5 = inlined_call_operand.hbm [shape: f32[4,128], index: 5, kind: output, shape index: {}]  }
   0x1   :  { %v22_v0 = vld [vmem:[%s297_s0 + $0x8] sm:$0xff]  ;;  %v21_v1 = vld [vmem:[%s297_s0] sm:$0xff]  ;;  %v26_v3 = vld [vmem:[%s298_s1 + $0x18] sm:$0xff]  ;;  %189 = vset.pattern.permute.xlu0 %v222_v4 }
   0x2   :  { %183 = vmatpush.msra.mxu2 %v22_v0  ;;  %184 = vmatpush.msra.mxu3 %v22_v0  ;;  %v24_v2 = vld [vmem:[%s298_s1 + $0x8] sm:$0xff]  ;;  %v30_v5 = vld [vmem:[%s299_s2 + $0x18] sm:$0xff]  ;;  %v23_v6 = vld [vmem:[%s298_s1] sm:$0xff] }
   0x3   :  { %78 = vmatpush.msra.mxu0 %v22_v0 }
   0x4   :  { %185 = vmatpush.msra.mxu2 %v21_v1  ;;  %186 = vmatpush.msra.mxu3 %v21_v1 }
   0x5   :  { %10 = vsyncpa [#allocation3], 0  ;;  %179 = vmatmul.msk.f32.vlgmr.msra.gmra.mxu2 %vm51_vm0, %v24_v2  ;;  %181 = vmatmul.msk.f32.vlgmr.msra.gmra.mxu3 %vm51_vm0, %v26_v3  ;;  %v28_v7 = vld [vmem:[%s299_s2 + $0x8] sm:$0xff]  ;;  %v25_v8 = vld [vmem:[%s298_s1 + $0x10] sm:$0xff]  ;;  %vm104_vm1 = vcmask 261120   ;;  %vm128_vm2 = vcmask 1043456  }
   0x6   :  { %48 = vperm.xlu0 %189, %v30_v5   ;;  %79 = vmatpush.msra.mxu0 %v21_v1  ;;  %v29_v9 = vld [vmem:[%s299_s2 + $0x10] sm:$0xff]  ;;  %v27_v10 = vld [vmem:[%s299_s2] sm:$0xff]  ;;  %s169_s16 = sshll.u32 %s302_s5, 4  ;;  %s170_s16 = int_to_ptr.hbm [resolvable:$true] %s169_s16 }
   0x7   :  { %178 = vmatmul.msk.f32.vlgmr.msra.gmra.mxu0 %vm51_vm0, %v23_v6  ;;  %190 = vset.pattern.permute.xlu1 %v222_v4  ;;  %v98_v11 = vld [vmem:[%s301_s4] sm:$0xf] }
   0x8   :  { %38 = vperm.xlu1 %190, %v28_v7   ;;  %191 = vset.pattern.permute.xlu2 %v222_v4  ;;  %v97_v28 = vld [vmem:[%s300_s3] sm:$0xf]  ;;  %s223_s3 = smov [#allocation2]  }
   0x9   :  { %101 = vperm.xlu2 %191, %v98_v11   ;;  %s167_s4 = sshll.u32 %s223_s3, 4  ;;  %s168_s4 = int_to_ptr.vmem [resolvable:$true] %s167_s4 }
   0xd   :  { %180 = vmatmul.msk.f32.gmra.mxu2 %vm51_vm0, %v25_v8 }
   0xe   :  { %43 = vperm.xlu0 %189, %v29_v9  }
  0x10   :  { %33 = vperm.xlu1 %190, %v27_v10  }
  0x63   :  { %v102_v29 = vpop.permute.xlu2 %101 }
  0x78   :  { %v49_v12 = vpop.permute.xlu0 %48 }
  0x7a   :  { %v39_v13 = vpop.permute.xlu1 %38 }
  0x80   :  { %v44_v18 = vpop.permute.xlu0 %43 }
  0x82   :  { %v34_v19 = vpop.permute.xlu1 %33 }
  0x84   :  { %v81_v20 = vpop.f32.mrf.mxu0 }
  0x85   :  { %v82_v24 = vadd.f32 %v81_v20, %v34_v19 }
  0x87   :  { %v93_v27 = vmax.f32 %v82_v24, 0.0 }
  0x88   :  { %v84_v14 = vpop.f32.mrf.mxu2  ;;  %v90_v15 = vpop.f32.mrf.mxu3 }
  0x89   :  { %v91_v16 = vadd.f32 %v90_v15, %v49_v12  ;;  %v85_v22 = vadd.f32 %v84_v14, %v39_v13 }
  0x8b   :  { %v96_v17 = vmax.f32 %v91_v16, 0.0  ;;  %v94_v26 = vmax.f32 %v85_v22, 0.0 }
  0x8d   :  { %120 = vmatpush.msra.mxu1 %v96_v17 }
  0x90   :  { %v87_v21 = vpop.f32.mrf.mxu2 }
  0x91   :  { %v88_v23 = vadd.f32 %v87_v21, %v44_v18 }
  0x93   :  { %v95_v25 = vmax.f32 %v88_v23, 0.0 }
  0x95   :  { %121 = vmatpush.msra.mxu1 %v95_v25 }
  0x97   :  { %122 = vmatpush.msra.mxu1 %v94_v26 }
  0x99   :  { %123 = vmatpush.msra.mxu1 %v93_v27 }
  0x9a   :  { %182 = vmatmul.msk.f32.vlgmr.msra.gmra.mxu1 %vm104_vm1, %v97_v28 }
 0x117   :  { %v125_v30 = vpop.f32.mrf.mxu1 }
 0x118   :  { %v126_v31 = vadd.f32 %v125_v30, %v102_v29 }
 0x11a   :  { %v129_v32 = vsel %vm128_vm2, %v126_v31, -inf }
 0x11b   :  { %v130_v33 = vrot.slane %v129_v32, 4 }
 0x11d   :  { %v131_v34 = vmax.f32 %v129_v32, %v130_v33 }
 0x11f   :  { %v132_v35 = vrot.slane %v131_v34, 2 }
 0x121   :  { %v133_v36 = vmax.f32 %v131_v34, %v132_v35 }
 0x123   :  { %v134_v37 = vrot.slane %v133_v36, 1 }
 0x125   :  { %v135_v38 = vmax.f32 %v133_v36, %v134_v37 }
 0x127   :  { %v136_v39 = vsub.f32 %v126_v31, %v135_v38 }
 0x129   :  { %v137_v40 = vmul.f32 1.442695, %v136_v39 }
 0x12b   :  { %192 = vpow2.f32 %v137_v40 }
 0x131   :  { %v193_v41 = vpop.eup %192 }
 0x132   :  { %v139_v42 = vsel %vm128_vm2, %v193_v41, 0.0 }
 0x133   :  { %v140_v43 = vrot.slane %v139_v42, 4 }
 0x135   :  { %v141_v44 = vadd.f32 %v140_v43, %v139_v42 }
 0x137   :  { %v142_v45 = vrot.slane %v141_v44, 2 }
 0x139   :  { %v143_v46 = vadd.f32 %v142_v45, %v141_v44 }
 0x13b   :  { %v144_v47 = vrot.slane %v143_v46, 1 }
 0x13d   :  { %v145_v48 = vadd.f32 %v144_v47, %v143_v46 }
 0x13f   :  { %194 = vrcp.f32 %v145_v48  ;;  %v157_v52 = vand.u32 2147483648, %v145_v48  ;;  %v155_v54 = vand.u32 2147483647, %v145_v48  ;;  %vm151_vm4 = vweird.f32 %v145_v48 }
 0x141   :  { %v158_v56 = vor.u32 1.1754944e-38, %v157_v52  ;;  %vm156_vm6 = vcmp.eq.f32.partialorder %v155_v54, 8.507059e+37 }
 0x145   :  { %v195_v49 = vpop.eup %194 }
 0x146   :  { %v147_v50 = vmul.f32 %v195_v49, %v145_v48  ;;  %vm152_vm3 = vweird.f32 %v195_v49 }
 0x147   :  { %vm153_vm5 = vmor %vm151_vm4, %vm152_vm3 }
 0x148   :  { %v148_v51 = vsub.f32 1.0, %v147_v50 }
 0x14a   :  { %v149_v53 = vmul.f32 %v195_v49, %v148_v51 }
 0x14c   :  { %v150_v55 = vadd.f32 %v195_v49, %v149_v53 }
 0x14e   :  { %v154_v57 = vsel %vm153_vm5, %v195_v49, %v150_v55 }
 0x14f   :  { %v159_v58 = vsel %vm156_vm6, %v158_v56, %v154_v57 }
 0x150   :  { %v160_v59 = vmul.f32 %v193_v41, %v159_v58 }
 0x152   :  { %161 = vst [vmem:[#allocation2] sm:$0xf] %v160_v59 }
 0x153   :  { %172 = dma.vmem_to_hbm [thread:$0]  %s168_s4, 64, %s170_s16, [#allocation3]  }
 0x154   :  { %220 = dma.done.wait [#allocation3], 64  }
 0x155   :  { %221 = vsyncadd [#allocation3], 4294967232 }
 0x156   :  { %177 = vsyncpa [#allocation3], 1 }

</bundles_post_ra>
